<compile_context>
chip_gen: v6e
topology: v6e:2x2x1
jax: 0.10.0
libtpu: 0.0.40
codegen_flags: <defaults>
</compile_context>

<pallas_src>
import functools

import jax
import jax.numpy as jnp
from jax.experimental import pallas as pl
from jax.experimental.pallas import tpu as pltpu


def _round_up(v, m):
    return (v + m - 1) // m * m


def _cdiv(a, b):
    return (a + b - 1) // b


def _vmem_budget():
    """(tiling budget bytes, vmem_limit_bytes) chosen per chip generation."""
    try:
        cap = int(pltpu.get_tpu_info().vmem_capacity_bytes)
    except Exception:
        cap = 64 << 20                       # conservative: assume v7x-sized VMEM
    if cap >= (128 << 20):                   # v5e / v6e: 128 MiB physical VMEM
        return 96 << 20, 100 << 20
    return 44 << 20, 48 << 20                # v7x: 64 MiB physical VMEM


def _has_bf16_elementwise():
    """True on chips with a bf16 VPU/EUP (v6e, v7x); False on v5e and older."""
    try:
        dev = jax.devices()[0]
        if dev.platform != "tpu":
            return False
        kind = dev.device_kind.lower()
    except Exception:
        return False
    return not any(f"v{g}" in kind for g in (2, 3, 4, 5))


# ---------------------------------------------------------------------------
# Kernels
# ---------------------------------------------------------------------------

def _mlp_resident_kernel(x_ref, w1_ref, b1_ref, w2_ref, b2_ref, o_ref, *,
                         bf16_gelu):
    # fn(x) = GELU(x @ W1 + b1) @ W2 + b2 ; out = fn(x) + x
    x = x_ref[...]                                        # (TM, D_pad)
    h = jnp.dot(x.astype(jnp.bfloat16), w1_ref[...],
                preferred_element_type=jnp.float32)       # (TM, H_pad) f32
    h = h + b1_ref[...]
    # TODO(synk): PyTorch nn.GELU() defaults to the exact erf form; the tanh
    # approximation (== nn.GELU(approximate='tanh')) is used because it has a
    # guaranteed Mosaic lowering.
    if bf16_gelu:
        h = jax.nn.gelu(h.astype(jnp.bfloat16), approximate=True)   # v6e/v7x
    else:
        h = jax.nn.gelu(h, approximate=True).astype(jnp.bfloat16)   # v5e-safe
    y = jnp.dot(h, w2_ref[...], preferred_element_type=jnp.float32)
    y = y + b2_ref[...]
    o_ref[...] = (y + x).astype(o_ref.dtype)              # residual add


def _mlp_stream_kernel(x_ref, w1_ref, b1_ref, w2_ref, b2_ref, o_ref, acc_ref,
                       *, bf16_gelu):
    # Weights streamed along H; second-matmul partial sums accumulated in f32.
    hs = pl.program_id(1)

    @pl.when(hs == 0)
    def _():
        acc_ref[...] = jnp.zeros_like(acc_ref)

    x = x_ref[...]                                        # (TM, D_pad)
    h = jnp.dot(x.astype(jnp.bfloat16), w1_ref[...],
                preferred_element_type=jnp.float32)       # (TM, TH) f32
    h = h + b1_ref[...]
    if bf16_gelu:
        h = jax.nn.gelu(h.astype(jnp.bfloat16), approximate=True)
    else:
        h = jax.nn.gelu(h, approximate=True).astype(jnp.bfloat16)
    acc_ref[...] += jnp.dot(h, w2_ref[...],
                            preferred_element_type=jnp.float32)

    @pl.when(hs == pl.num_programs(1) - 1)
    def _():
        o_ref[...] = (acc_ref[...] + b2_ref[...] + x).astype(o_ref.dtype)


# ---------------------------------------------------------------------------
# Tile selection
# ---------------------------------------------------------------------------

def _cap_tm_for_megacore(tm, m8):
    """Ensure >= 2 grid steps along M so v7x's second TensorCore gets work."""
    if m8 > 8:
        tm = min(tm, _round_up(_cdiv(m8, 2), 8))
    return max(min(tm, m8), 8)


def _pick_tm_resident(M, D_pad, H_pad, budget):
    """Largest M-tile fitting the VMEM budget with weights resident."""
    # Grid-invariant inputs are still double-buffered by default -> count 2x.
    resident = 2 * (2 * (D_pad * H_pad + H_pad * D_pad)   # bf16 W1 + W2
                    + 4 * (H_pad + D_pad))                # f32 biases
    per_row = (2 * 4 * D_pad      # x tile, f32, double-buffered
               + 2 * 4 * D_pad    # out tile, f32, double-buffered
               + 4 * H_pad        # GELU intermediate, f32
               + 2 * H_pad        # bf16 hidden
               + 2 * D_pad)       # bf16 cast of x
    avail = max(budget - resident, 8 * per_row)
    tm = min(avail // per_row, 1024)
    tm = max((tm // 8) * 8, 8)
    return _cap_tm_for_megacore(tm, _round_up(M, 8))


def _pick_tiles_stream(M, D_pad, H_pad, budget):
    """(TM, TH) for the H-streaming path (weights not resident)."""
    th = min(H_pad, 512)
    while H_pad % th:             # lane-aligned divisor of H_pad
        th -= 128
    resident = 2 * (2 * (D_pad * th + th * D_pad)         # streamed bf16 W tiles (2x buffered)
                    + 4 * (th + D_pad))                   # f32 bias tiles
    per_row = (2 * 4 * D_pad      # x tile, f32, double-buffered
               + 2 * 4 * D_pad    # out tile, f32, double-buffered
               + 4 * D_pad        # f32 accumulator scratch
               + 4 * th + 2 * th  # hidden tile f32 + bf16
               + 2 * D_pad)       # bf16 cast of x
    avail = max(budget - resident, 8 * per_row)
    tm = min(avail // per_row, 512)
    tm = max((tm // 8) * 8, 8)
    return _cap_tm_for_megacore(tm, _round_up(M, 8)), th


# ---------------------------------------------------------------------------
# Wrappers
# ---------------------------------------------------------------------------

def prepare_residual_mlp_params(w1, b1, w2, b2):
    """One-time weight prep (pad to lane-aligned shapes, cast to bf16).

    Hoisted out of the per-call path so the pad/cast HBM pass over the weights
    is not repeated on every forward call.
    """
    D, H = w1.shape
    D_pad, H_pad = _round_up(D, 128), _round_up(H, 128)
    if (D_pad, H_pad) != (D, H):
        w1 = jnp.pad(w1, ((0, D_pad - D), (0, H_pad - H)))
        w2 = jnp.pad(w2, ((0, H_pad - H), (0, D_pad - D)))
        b1 = jnp.pad(b1, (0, H_pad - H))
        b2 = jnp.pad(b2, (0, D_pad - D))
    w1p = w1.astype(jnp.bfloat16)
    w2p = w2.astype(jnp.bfloat16)
    b1p = b1.reshape(1, H_pad).astype(jnp.float32)
    b2p = b2.reshape(1, D_pad).astype(jnp.float32)
    return w1p, b1p, w2p, b2p


def residual_add_mlp(x, w1p, b1p, w2p, b2p, *, force_stream=False):
    """x: (B, N, D). Returns fn(x) + x, fn = Linear(w1,b1) -> GELU -> Linear(w2,b2).

    Weight/bias args must come from prepare_residual_mlp_params().
    """
    B, N, D = x.shape
    D_pad, H_pad = w1p.shape
    M = B * N

    budget, vmem_limit = _vmem_budget()
    bf16_gelu = _has_bf16_elementwise()

    # Resident weights cost 2x their size (default double-buffering of inputs).
    weight_bytes = 2 * (2 * (D_pad * H_pad + H_pad * D_pad)
                        + 4 * (H_pad + D_pad))
    use_stream = force_stream or weight_bytes > budget // 2

    if use_stream:
        TM, TH = _pick_tiles_stream(M, D_pad, H_pad, budget)
    else:
        TM = _pick_tm_resident(M, D_pad, H_pad, budget)
    M_pad = _round_up(M, TM)
    grid_m = M_pad // TM

    # Zero padding is exact: gelu(0) = 0, padded W/b rows/cols contribute
    # nothing, and the padded output rows/cols are sliced off below.  Both the
    # pad and the slice are skipped in the already-aligned (common) case.
    x2d = x.reshape(M, D)
    if M_pad != M or D_pad != D:
        x2d = jnp.pad(x2d, ((0, M_pad - M), (0, D_pad - D)))

    cost = pl.CostEstimate(
        flops=4 * M_pad * D_pad * H_pad,           # two matmuls
        transcendentals=M_pad * H_pad,             # tanh inside GELU
        bytes_accessed=(2 * 4 * M_pad * D_pad      # x in + out, f32
                        + 2 * 2 * D_pad * H_pad    # two bf16 weight matrices
                        + 4 * (H_pad + D_pad)),    # biases
    )
    cparams = pltpu.CompilerParams(
        dimension_semantics=(("parallel", "arbitrary") if use_stream
                             else ("parallel",)),
        vmem_limit_bytes=vmem_limit,
    )
    out_shape = jax.ShapeDtypeStruct((M_pad, D_pad), x.dtype)

    if use_stream:
        grid_h = H_pad // TH
        out = pl.pallas_call(
            functools.partial(_mlp_stream_kernel, bf16_gelu=bf16_gelu),
            out_shape=out_shape,
            grid_spec=pltpu.PrefetchScalarGridSpec(
                num_scalar_prefetch=0,
                grid=(grid_m, grid_h),
                in_specs=[
                    pl.BlockSpec((TM, D_pad), lambda i, h: (i, 0)),   # x tile
                    pl.BlockSpec((D_pad, TH), lambda i, h: (0, h)),   # W1 col-block
                    pl.BlockSpec((1, TH), lambda i, h: (0, h)),       # b1 slice
                    pl.BlockSpec((TH, D_pad), lambda i, h: (h, 0)),   # W2 row-block
                    pl.BlockSpec((1, D_pad), lambda i, h: (0, 0)),    # b2
                ],
                out_specs=pl.BlockSpec((TM, D_pad), lambda i, h: (i, 0)),
                scratch_shapes=[pltpu.VMEM((TM, D_pad), jnp.float32)],
            ),
            compiler_params=cparams,
            cost_estimate=cost,
        )(x2d, w1p, b1p, w2p, b2p)
    else:
        # NOTE: with extra VMEM headroom, pipeline_mode=pl.Buffered(3) on the
        # x spec is a cheap sweep to hide exposed HBM latency at small D/H.
        out = pl.pallas_call(
            functools.partial(_mlp_resident_kernel, bf16_gelu=bf16_gelu),
            out_shape=out_shape,
            grid_spec=pltpu.PrefetchScalarGridSpec(
                num_scalar_prefetch=0,
                grid=(grid_m,),
                in_specs=[
                    pl.BlockSpec((TM, D_pad), lambda i: (i, 0)),      # x tile
                    pl.BlockSpec((D_pad, H_pad), lambda i: (0, 0)),   # W1 (resident)
                    pl.BlockSpec((1, H_pad), lambda i: (0, 0)),       # b1
                    pl.BlockSpec((H_pad, D_pad), lambda i: (0, 0)),   # W2 (resident)
                    pl.BlockSpec((1, D_pad), lambda i: (0, 0)),       # b2
                ],
                out_specs=pl.BlockSpec((TM, D_pad), lambda i: (i, 0)),
            ),
            compiler_params=cparams,
            cost_estimate=cost,
        )(x2d, w1p, b1p, w2p, b2p)

    if M_pad != M or D_pad != D:
        out = out[:M, :D]
    return out.reshape(B, N, D)


def _reference(x, w1, b1, w2, b2):
    h = jax.nn.gelu(jnp.dot(x, w1) + b1, approximate=True)
    return jnp.dot(h, w2) + b2 + x


if __name__ == "__main__":
    key = jax.random.PRNGKey(0)
    B, N, D, H = 2, 8, 32, 128  # batch, seq, hidden, mlp-expansion

    kx, k1, k2, k3, k4 = jax.random.split(key, 5)
    x = jax.random.normal(kx, (B, N, D), dtype=jnp.float32)
    # deterministic parameter init (synthetic, not a checkpoint)
    w1 = jax.random.normal(k1, (D, H), dtype=jnp.float32) * 0.02
    b1 = jax.random.normal(k2, (H,), dtype=jnp.float32) * 0.02
    w2 = jax.random.normal(k3, (H, D), dtype=jnp.float32) * 0.02
    b2 = jax.random.normal(k4, (D,), dtype=jnp.float32) * 0.02

    params = prepare_residual_mlp_params(w1, b1, w2, b2)  # one-time, hoisted
    ref = _reference(x, w1, b1, w2, b2)

    # Default path (weights resident in VMEM at these sizes).
    run = jax.jit(residual_add_mlp)
    out = jax.block_until_ready(run(x, *params))
    assert out.shape == x.shape and out.dtype == x.dtype
    # bf16 matmul operands with f32 accumulation -> loosen tolerance vs pure f32.
    assert jnp.allclose(out, ref, atol=1e-2, rtol=1e-2), (
        float(jnp.max(jnp.abs(out - ref))))

    # H-streaming path (selected automatically when the weights exceed the
    # VMEM budget, e.g. production-size MLPs on v7x); forced here to validate.
    run_stream = jax.jit(functools.partial(residual_add_mlp, force_stream=True))
    out_s = jax.block_until_ready(run_stream(x, *params))
    assert jnp.allclose(out_s, ref, atol=1e-2, rtol=1e-2), (
        float(jnp.max(jnp.abs(out_s - ref))))

    print("KERNEL_OK")
</pallas_src>

<mosaic_0001>
module attributes {stable_mosaic.version = 11 : i64} {
  func.func @_mlp_resident_kernel(%arg0: i32, %arg1: memref<8x128xf32, #tpu.memory_space<vmem>>, %arg2: memref<128x128xbf16, #tpu.memory_space<vmem>>, %arg3: memref<1x128xf32, #tpu.memory_space<vmem>>, %arg4: memref<128x128xbf16, #tpu.memory_space<vmem>>, %arg5: memref<1x128xf32, #tpu.memory_space<vmem>>, %arg6: memref<8x128xf32, #tpu.memory_space<vmem>>) attributes {dimension_semantics = [#tpu.dimension_semantics<parallel>], iteration_bounds = array<i64: 2>, scalar_prefetch = 0 : i64, scratch_operands = 0 : i64, tpu.core_type = #tpu.core_type<tc>, window_params = [{transform_indices = @transform_0, window_bounds = array<i64: 8, 128>}, {pipeline_mode = #tpu.pipeline_mode<synchronous>, transform_indices = @transform_1, window_bounds = array<i64: 128, 128>}, {pipeline_mode = #tpu.pipeline_mode<synchronous>, transform_indices = @transform_2, window_bounds = array<i64: 1, 128>}, {pipeline_mode = #tpu.pipeline_mode<synchronous>, transform_indices = @transform_3, window_bounds = array<i64: 128, 128>}, {pipeline_mode = #tpu.pipeline_mode<synchronous>, transform_indices = @transform_4, window_bounds = array<i64: 1, 128>}, {transform_indices = @transform_5, window_bounds = array<i64: 8, 128>}]} {
    %c0 = arith.constant 0 : index
    %c0_0 = arith.constant 0 : index
    %0 = vector.load %arg1[%c0, %c0_0] : memref<8x128xf32, #tpu.memory_space<vmem>>, vector<8x128xf32>
    %1 = arith.truncf %0 : vector<8x128xf32> to vector<8x128xbf16>
    %c0_1 = arith.constant 0 : index
    %c0_2 = arith.constant 0 : index
    %2 = vector.load %arg2[%c0_1, %c0_2] : memref<128x128xbf16, #tpu.memory_space<vmem>>, vector<128x128xbf16>
    %cst = arith.constant dense<0.000000e+00> : vector<8x128xf32>
    %3 = tpu.matmul %1, %2, %cst {dimension_numbers = #tpu.dot_dimension_numbers<[1], [0], [0], [1], [0, 0, 1, 1], [], []>} : vector<8x128xbf16>, vector<128x128xbf16>, vector<8x128xf32> -> vector<8x128xf32>
    %c0_3 = arith.constant 0 : index
    %c0_4 = arith.constant 0 : index
    %4 = vector.load %arg3[%c0_3, %c0_4] : memref<1x128xf32, #tpu.memory_space<vmem>>, vector<1x128xf32>
    %5 = vector.broadcast %4 : vector<1x128xf32> to vector<8x128xf32>
    %6 = arith.addf %3, %5 : vector<8x128xf32>
    %7 = arith.mulf %6, %6 : vector<8x128xf32>
    %8 = arith.mulf %6, %7 : vector<8x128xf32>
    %cst_5 = arith.constant 4.471500e-02 : f32
    %9 = vector.broadcast %cst_5 : f32 to vector<8x128xf32>
    %10 = arith.mulf %9, %8 : vector<8x128xf32>
    %11 = arith.addf %6, %10 : vector<8x128xf32>
    %cst_6 = arith.constant 0.797884583 : f32
    %12 = vector.broadcast %cst_6 : f32 to vector<8x128xf32>
    %13 = arith.mulf %12, %11 : vector<8x128xf32>
    %14 = math.tanh %13 : vector<8x128xf32>
    %cst_7 = arith.constant 1.000000e+00 : f32
    %15 = vector.broadcast %cst_7 : f32 to vector<8x128xf32>
    %16 = arith.addf %15, %14 : vector<8x128xf32>
    %cst_8 = arith.constant 5.000000e-01 : f32
    %17 = vector.broadcast %cst_8 : f32 to vector<8x128xf32>
    %18 = arith.mulf %17, %16 : vector<8x128xf32>
    %19 = arith.mulf %6, %18 : vector<8x128xf32>
    %20 = arith.truncf %19 : vector<8x128xf32> to vector<8x128xbf16>
    %c0_9 = arith.constant 0 : index
    %c0_10 = arith.constant 0 : index
    %21 = vector.load %arg4[%c0_9, %c0_10] : memref<128x128xbf16, #tpu.memory_space<vmem>>, vector<128x128xbf16>
    %cst_11 = arith.constant dense<0.000000e+00> : vector<8x128xf32>
    %22 = tpu.matmul %20, %21, %cst_11 {dimension_numbers = #tpu.dot_dimension_numbers<[1], [0], [0], [1], [0, 0, 1, 1], [], []>} : vector<8x128xbf16>, vector<128x128xbf16>, vector<8x128xf32> -> vector<8x128xf32>
    %c0_12 = arith.constant 0 : index
    %c0_13 = arith.constant 0 : index
    %23 = vector.load %arg5[%c0_12, %c0_13] : memref<1x128xf32, #tpu.memory_space<vmem>>, vector<1x128xf32>
    %24 = vector.broadcast %23 : vector<1x128xf32> to vector<8x128xf32>
    %25 = arith.addf %22, %24 : vector<8x128xf32>
    %26 = arith.addf %25, %0 : vector<8x128xf32>
    %c0_14 = arith.constant 0 : index
    %c0_15 = arith.constant 0 : index
    %27 = vector.load %arg6[%c0_14, %c0_15] : memref<8x128xf32, #tpu.memory_space<vmem>>, vector<8x128xf32>
    tpu.vector_store %arg6[%c0_14, %c0_15], %26 {strides = array<i32>} : memref<8x128xf32, #tpu.memory_space<vmem>>, vector<8x128xf32>,
    return
  }
  func.func @transform_0(%arg0: i32) -> (i32, i32) {
    %c0_i32 = arith.constant 0 : i32
    %c0_i32_0 = arith.constant 0 : i32
    return %arg0, %c0_i32 : i32, i32
  }
  func.func @transform_1(%arg0: i32) -> (i32, i32) {
    %c0_i32 = arith.constant 0 : i32
    %c0_i32_0 = arith.constant 0 : i32
    %c0_i32_1 = arith.constant 0 : i32
    return %c0_i32, %c0_i32_0 : i32, i32
  }
  func.func @transform_2(%arg0: i32) -> (i32, i32) {
    %c0_i32 = arith.constant 0 : i32
    %c0_i32_0 = arith.constant 0 : i32
    %c0_i32_1 = arith.constant 0 : i32
    return %c0_i32, %c0_i32_0 : i32, i32
  }
  func.func @transform_3(%arg0: i32) -> (i32, i32) {
    %c0_i32 = arith.constant 0 : i32
    %c0_i32_0 = arith.constant 0 : i32
    %c0_i32_1 = arith.constant 0 : i32
    return %c0_i32, %c0_i32_0 : i32, i32
  }
  func.func @transform_4(%arg0: i32) -> (i32, i32) {
    %c0_i32 = arith.constant 0 : i32
    %c0_i32_0 = arith.constant 0 : i32
    %c0_i32_1 = arith.constant 0 : i32
    return %c0_i32, %c0_i32_0 : i32, i32
  }
  func.func @transform_5(%arg0: i32) -> (i32, i32) {
    %c0_i32 = arith.constant 0 : i32
    %c0_i32_0 = arith.constant 0 : i32
    return %arg0, %c0_i32 : i32, i32
  }
}

</mosaic_0001>

<bundles_post_ra>
// kernel: residual_add_mlp.1
= control target key start
LH: loop header
LB: loop body
LE: loop exit
PB: predicated region body
PF: predicated region fallthrough
CT: control target
= control target key end

     0   :  { %10 = vsyncpa [#allocation3], 0  ;;  %s881_s0 = inlined_call_operand.vmem [shape: f32[16,128], index: 0, kind: input, shape index: {}]   ;;  %s882_s1 = inlined_call_operand.hbm [shape: bf16[128,128], index: 1, kind: input, shape index: {}]   ;;  %s883_s2 = inlined_call_operand.vmem [shape: f32[1,128], index: 2, kind: input, shape index: {}]   ;;  %s884_s3 = inlined_call_operand.hbm [shape: bf16[128,128], index: 3, kind: input, shape index: {}]   ;;  %s885_s4 = inlined_call_operand.vmem [shape: f32[1,128], index: 4, kind: input, shape index: {}]   ;;  %s886_s5 = inlined_call_operand.vmem [shape: f32[16,128], index: 5, kind: output, shape index: {}]  }
   0x1   :  { %11 = vsyncpa [#allocation5], 0  ;;  %s806_s18 = smov 0  }
   0x2 LB: > { %s812_s19 = sadd.s32 4294967295, %s768_s18   ;;  %p564_p0 = scmp.ge.s32.totalorder %s768_s18, 1  ;;  %s768_s18 = sphi %s806_s18, %s17_s18  }
   0x3   : > { %p158_p1 = scmp.lt.s32.totalorder %s768_s18, 3  ;;  %s770_s20 = smov [#allocation2]  }
   0x4   : > { %s170_s21 = sshll.u32 %s770_s20, 4  ;;  %p666_p3 = scmp.eq.s32.totalorder %s812_s19, 0  ;;  %s171_s21 = int_to_ptr.vmem [resolvable:$true] %s170_s21 }
   0x5   : > { %p816_p2 = pnand %p564_p0, %p158_p1  ;;  %s771_s23 = smov [#allocation4]  }
   0x6   : > { %s186_s24 = sshll.u32 %s771_s23, 4  ;;  %s713_s26 = scalar_lea.vmem %s171_s21, 1024  ;;  %s187_s24 = int_to_ptr.vmem [resolvable:$true] %s186_s24 }
   0x7   : > { %p659_p4 = pneg %p816_p2  ;;  %p714_p7 = scmp.ne.s32.totalorder %s171_s21, %s713_s26 }
   0x8   : > { %p721_p10 = scmp.lt.s32.totalorder %s171_s21, %s171_s21  ;;  %p722_p11 = scmp.lt.s32.totalorder %s713_s26, %s713_s26 }
   0x9   : > { %p825_p5 = pnand %p666_p3, %p659_p4 }
   0xa   : > { %p723_p12 = por %p722_p11, %p721_p10 }
   0xb   : > { %p704_p6 = pneg %p825_p5 }
   0xd   : > { %p716_p8 = pnand %p714_p7, %p704_p6 }
   0xf   : > { %p717_p9 = pneg %p716_p8 }
  0x11   : > { %p724_p13 = pnand %p723_p12, %p717_p9 }
  0x13   : > { %727 = shalt.err (!%p724_p13)
}
  0x14   : > { %s772_s27 = smov 64   ;;  %s773_s28 = smov 4  }
  0x15   : > { %662 = dma.hbm_to_vmem [thread:$0]  (!%p825_p5), %s882_s1, 1024, %s171_s21, [#allocation3], %s772_s27, %s772_s27, %s773_s28  }
  0x16   : > { %s739_s6 = scalar_lea.vmem %s187_s24, 1024  ;;  %p747_p7 = scmp.lt.s32.totalorder %s187_s24, %s187_s24 }
  0x17   : > { %p740_p0 = scmp.ne.s32.totalorder %s187_s24, %s739_s6  ;;  %p748_p8 = scmp.lt.s32.totalorder %s739_s6, %s739_s6 }
  0x19   : > { %p742_p1 = pnand %p740_p0, %p704_p6  ;;  %p749_p10 = por %p748_p8, %p747_p7 }
  0x1b   : > { %p743_p4 = pneg %p742_p1 }
  0x1d   : > { %p750_p9 = pnand %p749_p10, %p743_p4 }
  0x1f   : > { %753 = shalt.err (!%p750_p9)
}
  0x20   : > { %665 = dma.hbm_to_vmem [thread:$0]  (!%p825_p5), %s884_s3, 1024, %s187_s24, [#allocation5], %s772_s27, %s772_s27, %s773_s28  }
  0x21   : > { %212 = sbr.rel (%p816_p2) target bundleno = 501 (0x1f5), region = 40 }
  0x26   : > { %759 = dma.done.wait (%p666_p3), [#allocation3], 1024  }
  0x27   : > { %761 = vsyncadd (%p666_p3), [#allocation3], 4294966272 }
  0x28   : > { %763 = dma.done.wait (%p666_p3), [#allocation5], 1024  }
  0x29   : > { %765 = vsyncadd (%p666_p3), [#allocation5], 4294966272  ;;  %v774_v0 = vmov 0.0   ;;  %vm775_vm0 = vmmov 0   ;;  %v684_v1 = vld [vmem:[#allocation2 + $0x38] sm:$0xff]   ;;  %v685_v2 = vld [vmem:[#allocation2 + $0x30] sm:$0xff]  }
  0x2a   : > { %611 = vmatprep.subr.bf16.mxu0 %v774_v0  ;;  %627 = vmatprep.mubr.msk.bf16.mxu0 %vm775_vm0, %v774_v0  ;;  %v686_v3 = vld [vmem:[#allocation2 + $0x28] sm:$0xff]   ;;  %v687_v4 = vld [vmem:[#allocation2 + $0x20] sm:$0xff]   ;;  %p242_p2 = scmp.lt.s32.totalorder %s812_s19, 1  ;;  %v688_v5 = vld [vmem:[#allocation2 + $0x18] sm:$0xff]  }
  0x2b   : > { %631 = vmatprep.subr.bf16.mxu1 %v774_v0  ;;  %647 = vmatprep.mubr.msk.bf16.mxu1 %vm775_vm0, %v774_v0  ;;  %v689_v6 = vld [vmem:[#allocation2 + $0x10] sm:$0xff]   ;;  %v690_v7 = vld [vmem:[#allocation2 + $0x8] sm:$0xff]   ;;  %v691_v8 = vld [vmem:[#allocation2] sm:$0xff]  }
  0x2c   : > { %612 = vmatpush3.bf16.msra.mxu0 %v684_v1  ;;  %s890_s19 = smov (!%p242_p2, %s812_s19), 1  ;;  %v692_v11 = vld [vmem:[#allocation4 + $0x38] sm:$0xff]   ;;  %v693_v12 = vld [vmem:[#allocation4 + $0x30] sm:$0xff]   ;;  %v694_v13 = vld [vmem:[#allocation4 + $0x28] sm:$0xff]  }
  0x2d   : > { %613 = vmatprep.subr.bf16.mxu0 %v774_v0  ;;  %s571_s9 = sshll.u32 %s890_s19, 3  ;;  %632 = vmatpush3.bf16.msra.mxu1 %v692_v11  ;;  %v695_v14 = vld [vmem:[#allocation4 + $0x20] sm:$0xff]   ;;  %v696_v15 = vld [vmem:[#allocation4 + $0x18] sm:$0xff]   ;;  %v697_v16 = vld [vmem:[#allocation4 + $0x10] sm:$0xff]  }
  0x2e   : > { %s245_s12 = scalar_lea.vmem %s881_s0, %s571_s9  ;;  %633 = vmatprep.subr.bf16.mxu1 %v774_v0  ;;  %v698_v17 = vld [vmem:[#allocation4 + $0x8] sm:$0xff]   ;;  %v699_v18 = vld [vmem:[#allocation4] sm:$0xff]   ;;  %s249_s21 = scalar_lea.vmem %s886_s5, %s571_s9 }
  0x2f   : > { %v251_v9 = vld [vmem:[%s245_s12] sm:$0xff] }
  0x30   : > { %614 = vmatpush3.bf16.msra.mxu0 %v685_v2  ;;  %v252_v10 = vpack.c.bf16 %v251_v9, %v251_v9  ;;  %v573_v19 = vld [vmem:[%s883_s2] ss:$0 sm:$0xff] }
  0x31   : > { %615 = vmatprep.subr.bf16.mxu0 %v774_v0  ;;  %634 = vmatpush3.bf16.msra.mxu1 %v693_v12  ;;  %v582_v35 = vld [vmem:[%s885_s4] ss:$0 sm:$0xff] }
  0x32   : > { %635 = vmatprep.subr.bf16.mxu1 %v774_v0 }
  0x34   : > { %616 = vmatpush3.bf16.msra.mxu0 %v686_v3 }
  0x35   : > { %617 = vmatprep.subr.bf16.mxu0 %v774_v0  ;;  %636 = vmatpush3.bf16.msra.mxu1 %v694_v13 }
  0x36   : > { %637 = vmatprep.subr.bf16.mxu1 %v774_v0 }
  0x38   : > { %618 = vmatpush3.bf16.msra.mxu0 %v687_v4 }
  0x39   : > { %619 = vmatprep.subr.bf16.mxu0 %v774_v0  ;;  %638 = vmatpush3.bf16.msra.mxu1 %v695_v14 }
  0x3a   : > { %639 = vmatprep.subr.bf16.mxu1 %v774_v0 }
  0x3c   : > { %620 = vmatpush3.bf16.msra.mxu0 %v688_v5 }
  0x3d   : > { %621 = vmatprep.subr.bf16.mxu0 %v774_v0  ;;  %640 = vmatpush3.bf16.msra.mxu1 %v696_v15 }
  0x3e   : > { %641 = vmatprep.subr.bf16.mxu1 %v774_v0 }
  0x40   : > { %622 = vmatpush3.bf16.msra.mxu0 %v689_v6 }
  0x41   : > { %623 = vmatprep.subr.bf16.mxu0 %v774_v0  ;;  %642 = vmatpush3.bf16.msra.mxu1 %v697_v16 }
  0x42   : > { %643 = vmatprep.subr.bf16.mxu1 %v774_v0 }
  0x44   : > { %624 = vmatpush3.bf16.msra.mxu0 %v690_v7 }
  0x45   : > { %625 = vmatprep.subr.bf16.mxu0 %v774_v0  ;;  %644 = vmatpush3.bf16.msra.mxu1 %v698_v17 }
  0x46   : > { %645 = vmatprep.subr.bf16.mxu1 %v774_v0 }
  0x48   : > { %626 = vmatpush3.bf16.msra.mxu0 %v691_v8 }
  0x49   : > { %646 = vmatpush3.bf16.msra.mxu1 %v699_v18 }
  0x4b   : > { %628 = vmatmul.mubr.bf16.vlgmr.msra.gmra.mxu0 %v252_v10 }
 0x10b   : > { %v358_v20 = vpop.f32.mrf.mxu0 }
 0x10c   : > { %v359_v21 = vadd.f32 %v573_v19, %v358_v20 }
 0x10d   : > { %v629_v22 = vpop.f32.mrf.mxu0 }
 0x10e   : > { %v364_v23 = vmul.f32 %v359_v21, %v359_v21 }
 0x10f   : > { %v361_v24 = vpop.f32.mrf.mxu0 }
 0x110   : > { %v365_v25 = vmul.f32 %v364_v23, %v359_v21 }
 0x111   : > { %v630_v26 = vpop.f32.mrf.mxu0 }
 0x112   : > { %v366_v27 = vmul.f32 0.044715, %v365_v25 }
 0x114   : > { %v367_v28 = vadd.f32 %v366_v27, %v359_v21 }
 0x116   : > { %v368_v29 = vmul.f32 0.7978846, %v367_v28 }
 0x118   : > { %700 = vtanh.f32 %v368_v29 }
 0x125   : > { %v701_v30 = vpop.eup %700 }
 0x126   : > { %v370_v31 = vadd.f32 1.0, %v701_v30 }
 0x128   : > { %v371_v32 = vmul.f32 0.5, %v370_v31 }
 0x12a   : > { %v372_v33 = vmul.f32 %v371_v32, %v359_v21 }
 0x12c   : > { %v373_v34 = vpack.c.bf16 %v372_v33, %v372_v33 }
 0x12e   : > { %648 = vmatmul.mubr.bf16.vlgmr.msra.gmra.mxu1 %v373_v34 }
 0x1ee   : > { %v479_v36 = vpop.f32.mrf.mxu1 }
 0x1ef   : > { %v480_v37 = vadd.f32 %v582_v35, %v479_v36 }
 0x1f0   : > { %v649_v38 = vpop.f32.mrf.mxu1 }
 0x1f1   : > { %v485_v39 = vadd.f32 %v480_v37, %v251_v9 }
 0x1f2   : > { %v482_v40 = vpop.f32.mrf.mxu1 }
 0x1f3   : > { %486 = vst [vmem:[%s249_s21] sm:$0xff] %v485_v39 }
 0x1f4   : > { %v650_v41 = vpop.f32.mrf.mxu1 }
 0x1f5 PF: > { %s17_s18 = sadd.s32 1, %s768_s18  }
 0x1f6   : > { %p14_p3 = scmp.ge.s32.totalorder %s17_s18, 4  }
 0x1f8   :  { %16 = sbr.rel (!%p14_p3) target bundleno = 2 (0x2), region = 79 }
 0x1fd   :  { %506 = vsyncpa [#allocation3], 1 }
 0x1fe   :  { %508 = vsyncpa [#allocation3 + $0x1], 1 }
 0x1ff   :  { %509 = vsyncpa [#allocation5], 1 }

</bundles_post_ra>
